<compile_context>
chip_gen: v7x
topology: tpu7x:2x2x1
jax: 0.10.0
libtpu: 0.0.40
codegen_flags: <defaults>
</compile_context>

<pallas_src>
import math

import jax
import jax.numpy as jnp
from jax import lax
from jax.experimental import pallas as pl
from jax.experimental.pallas import tpu as pltpu


def _round_up(a, b):
    return (a + b - 1) // b * b


def _mlp_kernel(x_ref, w1_ref, b1_ref, w2_ref, b2_ref, o_ref, acc_ref):
    # x_ref:  (tm, d_model)   bf16
    # w1_ref: (d_model, tk)   bf16   (k-th chunk of W1 columns)
    # b1_ref: (1, tk)         f32
    # w2_ref: (tk, d_model)   bf16   (k-th chunk of W2 rows)
    # b2_ref: (1, d_model)    f32
    # o_ref:  (tm, d_model)   out dtype
    # acc_ref:(tm, d_model)   f32 accumulator over the d_ff (k) axis
    k = pl.program_id(1)

    @pl.when(k == 0)
    def _():
        acc_ref[...] = jnp.zeros_like(acc_ref)

    # feedforward_1 chunk: bf16 x bf16 -> f32 on the MXU
    h = jnp.dot(x_ref[...], w1_ref[...], preferred_element_type=jnp.float32)
    h = h + b1_ref[...]

    # nn.GELU() default = exact (erf-based) GELU, computed in f32
    h = 0.5 * h * (1.0 + lax.erf(h * (1.0 / math.sqrt(2.0))))

    # feedforward_2 chunk, accumulated over d_ff chunks (f32 accumulation)
    acc_ref[...] += jnp.dot(h.astype(w2_ref.dtype), w2_ref[...],
                            preferred_element_type=jnp.float32)

    @pl.when(k == pl.num_programs(1) - 1)
    def _():
        # Dropout is identity in eval mode; b2 added once at the end.
        o_ref[...] = (acc_ref[...] + b2_ref[...]).astype(o_ref.dtype)


def gpt2_mlp_linear_pallas(x, w1, b1, w2, b2, *, tm=256, tk=512):
    """x: (B, S, d_model) -> (B, S, d_model).

    w1: (d_model, d_ff), b1: (d_ff,), w2: (d_ff, d_model), b2: (d_model,).
    """
    B, S, d_model = x.shape
    d_ff = w1.shape[1]
    M = B * S
    out_dtype = x.dtype

    # ---- row (token) tile: as large as possible, multiple of 8 ----
    tm = max(8, min(_round_up(tm, 8), _round_up(M, 8)))
    # keep at least two tiles on the parallel axis when possible (v7x has 2 TensorCores)
    if pl.cdiv(M, tm) <= 1 and M > 8:
        tm = _round_up(pl.cdiv(M, 2), 8)
    M_pad = _round_up(M, tm)

    # ---- d_ff (reduction) chunk ----
    if d_ff <= tk:
        tk = d_ff                    # single chunk: block spans full d_ff (no 128-alignment needed)
        dff_pad = d_ff
    else:
        tk = _round_up(tk, 128)      # lane-dim blocks must be multiples of 128
        dff_pad = _round_up(d_ff, tk)

    # ---- pad (remainder handling) and cast matmul operands to bf16 ----
    x2d = x.reshape(M, d_model)
    if M_pad != M:
        x2d = jnp.pad(x2d, ((0, M_pad - M), (0, 0)))
    if dff_pad != d_ff:
        # zero-padded d_ff columns: gelu(0 + 0) = 0, so they contribute nothing to matmul 2
        w1 = jnp.pad(w1, ((0, 0), (0, dff_pad - d_ff)))
        b1 = jnp.pad(b1, (0, dff_pad - d_ff))
        w2 = jnp.pad(w2, ((0, dff_pad - d_ff), (0, 0)))

    x2d = x2d.astype(jnp.bfloat16)   # bf16 MXU operands, f32 accumulation
    w1 = w1.astype(jnp.bfloat16)
    w2 = w2.astype(jnp.bfloat16)
    b1_2d = b1.reshape(1, dff_pad).astype(jnp.float32)
    b2_2d = b2.reshape(1, d_model).astype(jnp.float32)

    grid = (M_pad // tm, dff_pad // tk)   # (parallel row tiles, arbitrary d_ff reduction)

    out2d = pl.pallas_call(
        _mlp_kernel,
        out_shape=jax.ShapeDtypeStruct((M_pad, d_model), out_dtype),
        grid=grid,
        in_specs=[
            pl.BlockSpec((tm, d_model), lambda i, k: (i, 0)),    # x rows (same across k)
            pl.BlockSpec((d_model, tk), lambda i, k: (0, k)),    # W1 column chunk (streamed)
            pl.BlockSpec((1, tk), lambda i, k: (0, k)),          # b1 chunk
            pl.BlockSpec((tk, d_model), lambda i, k: (k, 0)),    # W2 row chunk (streamed)
            pl.BlockSpec((1, d_model), lambda i, k: (0, 0)),     # b2 (grid-invariant, tiny)
        ],
        out_specs=pl.BlockSpec((tm, d_model), lambda i, k: (i, 0)),
        scratch_shapes=[pltpu.VMEM((tm, d_model), jnp.float32)],
        compiler_params=pltpu.CompilerParams(
            dimension_semantics=("parallel", "arbitrary"),
        ),
    )(x2d, w1, b1_2d, w2, b2_2d)

    return out2d[:M].reshape(B, S, d_model)


def _reference(x, w1, b1, w2, b2):
    """Mirrors the kernel numerics (bf16 matmul operands, f32 accumulation, erf GELU)."""
    B, S, d_model = x.shape
    xb = x.reshape(-1, d_model).astype(jnp.bfloat16)
    w1b = w1.astype(jnp.bfloat16)
    w2b = w2.astype(jnp.bfloat16)
    h = jnp.dot(xb, w1b, preferred_element_type=jnp.float32) + b1
    h = 0.5 * h * (1.0 + lax.erf(h / jnp.sqrt(2.0)))
    out = jnp.dot(h.astype(jnp.bfloat16), w2b, preferred_element_type=jnp.float32) + b2
    return out.reshape(B, S, d_model).astype(x.dtype)


if __name__ == "__main__":
    # Small shapes consistent with the module (batch, seq, d_model); S=9 exercises the
    # ragged-row padding path and tk=128 exercises the streamed-d_ff reduction path.
    B, S, d_model, d_ff = 2, 9, 64, 256

    key = jax.random.PRNGKey(0)
    kx, kw1, kb1, kw2, kb2 = jax.random.split(key, 5)

    x = jax.random.normal(kx, (B, S, d_model), dtype=jnp.float32)
    w1 = 0.02 * jax.random.normal(kw1, (d_model, d_ff), dtype=jnp.float32)
    b1 = 0.02 * jax.random.normal(kb1, (d_ff,), dtype=jnp.float32)
    w2 = 0.02 * jax.random.normal(kw2, (d_ff, d_model), dtype=jnp.float32)
    b2 = 0.02 * jax.random.normal(kb2, (d_model,), dtype=jnp.float32)

    # TODO(synk): nn.Dropout(p=0.1) in training mode (RNG mask + 1/(1-p) scaling) is not
    # implemented; this kernel implements eval-mode (identity) dropout semantics.

    out = gpt2_mlp_linear_pallas(x, w1, b1, w2, b2, tk=128)
    out = jax.block_until_ready(out)

    ref = _reference(x, w1, b1, w2, b2)
    assert out.shape == (B, S, d_model)
    assert jnp.allclose(out, ref, atol=1e-3, rtol=1e-3), "mismatch vs reference"

    print("KERNEL_OK")
</pallas_src>

<mosaic_0001>
module attributes {stable_mosaic.version = 11 : i64} {
  func.func @_mlp_kernel(%arg0: i32, %arg1: i32, %arg2: memref<16x64xbf16, #tpu.memory_space<vmem>>, %arg3: memref<64x128xbf16, #tpu.memory_space<vmem>>, %arg4: memref<1x128xf32, #tpu.memory_space<vmem>>, %arg5: memref<128x64xbf16, #tpu.memory_space<vmem>>, %arg6: memref<1x64xf32, #tpu.memory_space<vmem>>, %arg7: memref<16x64xf32, #tpu.memory_space<vmem>>, %arg8: memref<16x64xf32, #tpu.memory_space<vmem>>) attributes {dimension_semantics = [#tpu.dimension_semantics<parallel>, #tpu.dimension_semantics<arbitrary>], iteration_bounds = array<i64: 2, 2>, scalar_prefetch = 0 : i64, scratch_operands = 1 : i64, tpu.core_type = #tpu.core_type<tc>, window_params = [{transform_indices = @transform_0, window_bounds = array<i64: 16, 64>}, {transform_indices = @transform_1, window_bounds = array<i64: 64, 128>}, {transform_indices = @transform_2, window_bounds = array<i64: 1, 128>}, {transform_indices = @transform_3, window_bounds = array<i64: 128, 64>}, {pipeline_mode = #tpu.pipeline_mode<synchronous>, transform_indices = @transform_4, window_bounds = array<i64: 1, 64>}, {transform_indices = @transform_5, window_bounds = array<i64: 16, 64>}]} {
    %c0_i32 = arith.constant 0 : i32
    %0 = arith.cmpi eq, %arg1, %c0_i32 : i32
    %1 = arith.extui %0 : i1 to i32
    %c0_i32_0 = arith.constant 0 : i32
    %2 = arith.cmpi ne, %1, %c0_i32_0 : i32
    scf.if %2 {
      %cst_17 = arith.constant 0.000000e+00 : f32
      %26 = vector.broadcast %cst_17 : f32 to vector<16x64xf32>
      %c0_18 = arith.constant 0 : index
      %c0_19 = arith.constant 0 : index
      %27 = vector.load %arg8[%c0_18, %c0_19] : memref<16x64xf32, #tpu.memory_space<vmem>>, vector<16x64xf32>
      tpu.vector_store %arg8[%c0_18, %c0_19], %26 {strides = array<i32>} : memref<16x64xf32, #tpu.memory_space<vmem>>, vector<16x64xf32>,
    } else {
    }
    %c0 = arith.constant 0 : index
    %c0_1 = arith.constant 0 : index
    %3 = vector.load %arg2[%c0, %c0_1] : memref<16x64xbf16, #tpu.memory_space<vmem>>, vector<16x64xbf16>
    %c0_2 = arith.constant 0 : index
    %c0_3 = arith.constant 0 : index
    %4 = vector.load %arg3[%c0_2, %c0_3] : memref<64x128xbf16, #tpu.memory_space<vmem>>, vector<64x128xbf16>
    %cst = arith.constant dense<0.000000e+00> : vector<16x128xf32>
    %5 = tpu.matmul %3, %4, %cst {dimension_numbers = #tpu.dot_dimension_numbers<[1], [0], [0], [1], [0, 0, 1, 1], [], []>} : vector<16x64xbf16>, vector<64x128xbf16>, vector<16x128xf32> -> vector<16x128xf32>
    %c0_4 = arith.constant 0 : index
    %c0_5 = arith.constant 0 : index
    %6 = vector.load %arg4[%c0_4, %c0_5] : memref<1x128xf32, #tpu.memory_space<vmem>>, vector<1x128xf32>
    %7 = vector.broadcast %6 : vector<1x128xf32> to vector<16x128xf32>
    %8 = arith.addf %5, %7 : vector<16x128xf32>
    %cst_6 = arith.constant 5.000000e-01 : f32
    %9 = vector.broadcast %cst_6 : f32 to vector<16x128xf32>
    %10 = arith.mulf %9, %8 : vector<16x128xf32>
    %cst_7 = arith.constant 0.707106769 : f32
    %11 = vector.broadcast %cst_7 : f32 to vector<16x128xf32>
    %12 = arith.mulf %8, %11 : vector<16x128xf32>
    %13 = math.erf %12 : vector<16x128xf32>
    %cst_8 = arith.constant 1.000000e+00 : f32
    %14 = vector.broadcast %cst_8 : f32 to vector<16x128xf32>
    %15 = arith.addf %14, %13 : vector<16x128xf32>
    %16 = arith.mulf %10, %15 : vector<16x128xf32>
    %c0_9 = arith.constant 0 : index
    %c0_10 = arith.constant 0 : index
    %17 = vector.load %arg8[%c0_9, %c0_10] : memref<16x64xf32, #tpu.memory_space<vmem>>, vector<16x64xf32>
    %18 = arith.truncf %16 : vector<16x128xf32> to vector<16x128xbf16>
    %c0_11 = arith.constant 0 : index
    %c0_12 = arith.constant 0 : index
    %19 = vector.load %arg5[%c0_11, %c0_12] : memref<128x64xbf16, #tpu.memory_space<vmem>>, vector<128x64xbf16>
    %cst_13 = arith.constant dense<0.000000e+00> : vector<16x64xf32>
    %20 = tpu.matmul %18, %19, %cst_13 {dimension_numbers = #tpu.dot_dimension_numbers<[1], [0], [0], [1], [0, 0, 1, 1], [], []>} : vector<16x128xbf16>, vector<128x64xbf16>, vector<16x64xf32> -> vector<16x64xf32>
    %21 = arith.addf %17, %20 : vector<16x64xf32>
    %c0_14 = arith.constant 0 : index
    %c0_15 = arith.constant 0 : index
    %22 = vector.load %arg8[%c0_14, %c0_15] : memref<16x64xf32, #tpu.memory_space<vmem>>, vector<16x64xf32>
    tpu.vector_store %arg8[%c0_14, %c0_15], %21 {strides = array<i32>} : memref<16x64xf32, #tpu.memory_space<vmem>>, vector<16x64xf32>,
    %c1_i32 = arith.constant 1 : i32
    %23 = arith.cmpi eq, %arg1, %c1_i32 : i32
    %24 = arith.extui %23 : i1 to i32
    %c0_i32_16 = arith.constant 0 : i32
    %25 = arith.cmpi ne, %24, %c0_i32_16 : i32
    scf.if %25 {
      %c0_17 = arith.constant 0 : index
      %c0_18 = arith.constant 0 : index
      %26 = vector.load %arg8[%c0_17, %c0_18] : memref<16x64xf32, #tpu.memory_space<vmem>>, vector<16x64xf32>
      %c0_19 = arith.constant 0 : index
      %c0_20 = arith.constant 0 : index
      %27 = vector.load %arg6[%c0_19, %c0_20] : memref<1x64xf32, #tpu.memory_space<vmem>>, vector<1x64xf32>
      %28 = vector.broadcast %27 : vector<1x64xf32> to vector<16x64xf32>
      %29 = arith.addf %26, %28 : vector<16x64xf32>
      %c0_21 = arith.constant 0 : index
      %c0_22 = arith.constant 0 : index
      %30 = vector.load %arg7[%c0_21, %c0_22] : memref<16x64xf32, #tpu.memory_space<vmem>>, vector<16x64xf32>
      tpu.vector_store %arg7[%c0_21, %c0_22], %29 {strides = array<i32>} : memref<16x64xf32, #tpu.memory_space<vmem>>, vector<16x64xf32>,
    } else {
    }
    return
  }
  func.func @transform_0(%arg0: i32, %arg1: i32) -> (i32, i32) {
    %c0_i32 = arith.constant 0 : i32
    %c0_i32_0 = arith.constant 0 : i32
    return %arg0, %c0_i32 : i32, i32
  }
  func.func @transform_1(%arg0: i32, %arg1: i32) -> (i32, i32) {
    %c0_i32 = arith.constant 0 : i32
    %c0_i32_0 = arith.constant 0 : i32
    return %c0_i32, %arg1 : i32, i32
  }
  func.func @transform_2(%arg0: i32, %arg1: i32) -> (i32, i32) {
    %c0_i32 = arith.constant 0 : i32
    %c0_i32_0 = arith.constant 0 : i32
    return %c0_i32, %arg1 : i32, i32
  }
  func.func @transform_3(%arg0: i32, %arg1: i32) -> (i32, i32) {
    %c0_i32 = arith.constant 0 : i32
    %c0_i32_0 = arith.constant 0 : i32
    return %arg1, %c0_i32 : i32, i32
  }
  func.func @transform_4(%arg0: i32, %arg1: i32) -> (i32, i32) {
    %c0_i32 = arith.constant 0 : i32
    %c0_i32_0 = arith.constant 0 : i32
    %c0_i32_1 = arith.constant 0 : i32
    return %c0_i32, %c0_i32_0 : i32, i32
  }
  func.func @transform_5(%arg0: i32, %arg1: i32) -> (i32, i32) {
    %c0_i32 = arith.constant 0 : i32
    %c0_i32_0 = arith.constant 0 : i32
    return %arg0, %c0_i32 : i32, i32
  }
}

</mosaic_0001>

<bundles_post_ra>
// kernel: tpu_custom_call.1
= control target key start
LH: loop header
LB: loop body
LE: loop exit
PB: predicated region body
PF: predicated region fallthrough
CT: control target
= control target key end

     0   :  { %s1288_s0 = inlined_call_operand.vmem [shape: bf16[32,64], index: 0, kind: input, shape index: {}]   ;;  %s1289_s1 = inlined_call_operand.vmem [shape: bf16[64,256], index: 1, kind: input, shape index: {}]   ;;  %s1290_s2 = inlined_call_operand.vmem [shape: f32[1,256], index: 2, kind: input, shape index: {}]   ;;  %s1291_s3 = inlined_call_operand.vmem [shape: bf16[256,64], index: 3, kind: input, shape index: {}]   ;;  %s1292_s4 = inlined_call_operand.vmem [shape: f32[1,64], index: 4, kind: input, shape index: {}]   ;;  %s1293_s5 = inlined_call_operand.hbm [shape: f32[32,64], index: 5, kind: output, shape index: {}]  }
   0x1   :  { %1300 = sst [smem:[#allocation14_spill]] %s1289_s1 }
   0x2   :  { %10 = vsyncpa [#allocation5], 0 }
   0x3   :  { %12 = vsyncpa [#allocation5 + $0x1], 0  ;;  %s1067_s18 = smov 0   ;;  %s1069_s19 = smov 0  }
   0x4   :  { %s1071_s20 = smov 0   ;;  %s1073_s21 = smov 0  }
   0x5   :  { %s1075_s22 = smov 0   ;;  %s1077_s23 = smov 0  }
   0x6   :  { %s1079_s24 = smov 0   ;;  %s1081_s25 = smov 0  }
   0x7   :  { %s1083_s26 = smov 0   ;;  %s1085_s27 = smov 0  }
   0x8 LB: > { %1301 = sst [smem:[#allocation7_spill]] %s1009_s22  ;;  %s727_s28 = sadd.s32 4294967295, %s1029_s27   ;;  %s1029_s27 = sphi %s1085_s27, %s18_s27   ;;  %s1025_s26 = sphi %s1083_s26, %s1319_s26   ;;  %s1021_s25 = sphi %s1081_s25, %s1318_s25   ;;  %s1017_s24 = sphi %s1079_s24, %s1317_s24   ;;  %s1013_s23 = sphi %s1077_s23, %s1316_s23   ;;  %s1009_s22 = sphi %s1075_s22, %s1315_s22   ;;  %s1005_s21 = sphi %s1073_s21, %s1314_s21   ;;  %s1001_s20 = sphi %s1071_s20, %s1322_s20   ;;  %s997_s19 = sphi %s1069_s19, %s1321_s19   ;;  %s993_s18 = sphi %s1067_s18, %s1320_s18  }
   0x9   : > { %1302 = sst [smem:[#allocation8_spill]] %s1021_s25  ;;  %s728_s29 = sadd.s32 4294967294, %s1029_s27  }
   0xa   : > { %1303 = sst [smem:[#allocation9_spill]] %s1025_s26  ;;  %s27_s30 = sadd.s32 1, %s1021_s25 }
   0xb   : > { %s30_s6 = sadd.s32 1, %s1025_s26  ;;  %p28_p0 = scmp.ge.s32.totalorder %s27_s30, 2 }
   0xc   : > { %s63_s7 = sadd.s32 1, %s1009_s22  ;;  %p70_p1 = scmp.ne.s32.totalorder %s1009_s22, %s1005_s21 }
   0xd   : > { %p71_p2 = scmp.eq.s32.totalorder %s1029_s27, 0  ;;  %s1324_s30 = smov (%p28_p0, %s27_s30), 0 }
   0xe   : > { %1304 = sst [smem:[#allocation10_spill]] %s1324_s30  ;;  %s1326_s6 = smov (!%p28_p0, %s30_s6), %s1025_s26 }
   0xf   : > { %s60_s8 = ssub.s32 %s1021_s25, %s1324_s30  ;;  %p1130_p3 = por %p71_p2, %p70_p1 }
  0x10   : > { %p32_p4 = scmp.ge.s32.totalorder %s1326_s6, 2  ;;  %p61_p5 = scmp.eq.s32.totalorder %s60_s8, 0 }
  0x11   : > { %s162_s10 = sadd.s32 1, %s1001_s20  ;;  %p172_p6 = scmp.ne.s32.totalorder %s1001_s20, %s997_s19 }
  0x12   : > { %s1328_s6 = smov (%p32_p4, %s1326_s6), 0  ;;  %p173_p7 = scmp.eq.s32.totalorder %s727_s28, 3 }
  0x13   : > { %1306 = sst [smem:[#allocation11_spill]] %s1328_s6  ;;  %s159_s12 = ssub.s32 %s1025_s26, %s1328_s6 }
  0x14   : > { %s1140_s11 = scalar_select %p61_p5, %s1009_s22, %s63_s7  }
  0x15   : > { %p160_p8 = scmp.eq.s32.totalorder %s159_s12, 0  ;;  %p178_p9 = scmp.ne.s32.totalorder %s997_s19, %s993_s18 }
  0x16   : > { %1307 = sst [smem:[#allocation12_spill]] %s1140_s11  ;;  %p1146_p10 = por %p173_p7, %p172_p6 }
  0x17   : > { %p179_p11 = scmp.eq.s32.totalorder %s728_s29, 3  ;;  %p730_p13 = scmp.ge.s32.totalorder %s1029_s27, 4 }
  0x18   : > { %s1151_s14 = scalar_select %p160_p8, %s1001_s20, %s162_s10  }
  0x19   : > { %p1153_p12 = por %p179_p11, %p178_p9  ;;  %198 = sbr.rel (%p730_p13) target bundleno = 47 (0x2f), region = 20 }
  0x1a   : > { %1309 = sst [smem:[#allocation13_spill]] %s1151_s14 }
  0x20   : > { %210 = sbr.rel (!%p1130_p3) target bundleno = 47 (0x2f), region = 28  ;;  %s212_s16 = sand.u32 (%p1130_p3), 1, %s1009_s22  }
  0x21   : > { %s732_s17 = sshll.u32 (%p1130_p3), %s1021_s25, 2  ;;  %s731_s28 = sshll.u32 (%p1130_p3), %s212_s16, 5 }
  0x22   : > { %s1311_s1 = sld [smem:[#allocation14_spill]] (%p1130_p3)  ;;  %s214_s10 = scalar_lea.vmem (%p1130_p3), [#allocation3], %s731_s28 }
  0x28   : > { %s216_s29 = scalar_lea.vmem %s1311_s1, %s732_s17 }
  0x29   : > { %v232_v0 = vld [vmem:[%s216_s29] sm:$0xf]  ;;  %v234_v1 = vld [vmem:[%s216_s29 + $0x8] sm:$0xf]  ;;  %v236_v2 = vld [vmem:[%s216_s29 + $0x10] sm:$0xf] }
  0x2a   : > { %233 = vst [vmem:[%s214_s10] sm:$0xf] %v232_v0  ;;  %235 = vst [vmem:[%s214_s10 + $0x4] sm:$0xf] %v234_v1  ;;  %v238_v3 = vld [vmem:[%s216_s29 + $0x18] sm:$0xf] }
  0x2b   : > { %v240_v4 = vld [vmem:[%s216_s29 + $0x20] sm:$0xf]  ;;  %237 = vst [vmem:[%s214_s10 + $0x8] sm:$0xf] %v236_v2  ;;  %239 = vst [vmem:[%s214_s10 + $0xc] sm:$0xf] %v238_v3 }
  0x2c   : > { %241 = vst [vmem:[%s214_s10 + $0x10] sm:$0xf] %v240_v4  ;;  %v242_v5 = vld [vmem:[%s216_s29 + $0x28] sm:$0xf]  ;;  %v244_v6 = vld [vmem:[%s216_s29 + $0x30] sm:$0xf] }
  0x2d   : > { %v246_v7 = vld [vmem:[%s216_s29 + $0x38] sm:$0xf]  ;;  %243 = vst [vmem:[%s214_s10 + $0x14] sm:$0xf] %v242_v5  ;;  %245 = vst [vmem:[%s214_s10 + $0x18] sm:$0xf] %v244_v6 }
  0x2e   : > { %247 = vst [vmem:[%s214_s10 + $0x1c] sm:$0xf] %v246_v7 }
  0x2f PF: > { %p733_p0 = scmp.ge.s32.totalorder %s1029_s27, 1  ;;  %p300_p1 = scmp.lt.s32.totalorder %s1029_s27, 5 }
  0x31   : > { %p301_p2 = pnand %p733_p0, %p300_p1 }
  0x32   : > { %s307_s9 = sand.u32 (!%p301_p2), 1, %s1005_s21   ;;  %s1296_s12 = sand.u32 (!%p301_p2), 1, %s997_s19  }
  0x33   : > { %304 = sbr.rel (%p301_p2) target bundleno = 574 (0x23e), region = 77  ;;  %s734_s16 = sshll.u32 (!%p301_p2), %s307_s9, 5 }
  0x34   : > { %s735_s17 = sshll.u32 (!%p301_p2), %s1296_s12, 4  ;;  %s736_s28 = sshll.u32 (!%p301_p2), %s1017_s24, 1 }
  0x35   : > { %p353_p3 = scmp.lt.s32.totalorder (!%p301_p2), %s1013_s23, 1  ;;  %p348_p4 = scmp.lt.s32.totalorder (!%p301_p2), %s736_s28, 3 }
  0x36   : > { %s738_s7 = sshll.u32 (!%p301_p2), %s1013_s23, 4  ;;  %s309_s22 = scalar_lea.vmem (!%p301_p2), [#allocation3], %s734_s16 }
  0x37   : > { %p357_p5 = scmp.lt.s32.totalorder (!%p301_p2), %s738_s7, 31  ;;  %s1191_s14 = scalar_lea.vmem (!%p301_p2), [#allocation4], %s735_s17 }
  0x38   : > { %p740_p6 = scmp.ne.s32.totalorder (!%p301_p2), %s1013_s23, 0 }
  0x3a   : > { %s1175_s8 = scalar_select %p353_p3, %s1013_s23, 1 }
  0x3b   : > { %s1330_s28 = smov (!%p348_p4, %s736_s28), 3  ;;  %s1332_s7 = smov (!%p357_p5, %s738_s7), 31 }
  0x3c   : > { %s355_s1 = scalar_lea.vmem %s1290_s2, %s1175_s8  ;;  %s737_s6 = sshll.u32 %s1330_s28, 2  ;;  %vm368_vm0 = vcmask (!%p740_p6), 523264   ;;  %v1031_v8 = vmov (!%p740_p6), 0.0  }
  0x3d   : > { %s1184_s9 = scalar_lea.vmem %s1288_s0, %s737_s6  ;;  %s739_s12 = sshll.u32 %s1332_s7, 2  ;;  %369 = vst.msk [vmem:[#allocation2] sm:$0xff] (!%p740_p6), %vm368_vm0, %v1031_v8  ;;  %370 = vst.msk [vmem:[#allocation2 + $0x8] sm:$0xff] (!%p740_p6), %vm368_vm0, %v1031_v8 }
  0x3e   : > { %s1189_s11 = scalar_lea.vmem %s1291_s3, %s739_s12  ;;  %367 = sbr.rel (%p740_p6) target bundleno = 69 (0x45), region = 85 }
  0x45 PF: > { %v902_v9 = vld [vmem:[%s309_s22] sm:$0xff]   ;;  %v1032_v10 = vmov 0.0   ;;  %v903_v11 = vld [vmem:[%s309_s22 + $0x8] sm:$0xff]   ;;  %vm1033_vm1 = vmmov 0   ;;  %v907_v12 = vld [vmem:[%s1189_s11] sm:$0xff]   ;;  %vm417_vm2 = vcmask 523264  }
  0x46   : > { %778 = vmatprep.subr.bf16.mxu0 %v1032_v10  ;;  %790 = vmatprep.subr.bf16.mxu1 %v1032_v10  ;;  %v904_v13 = vld [vmem:[%s309_s22 + $0x10] sm:$0xff]   ;;  %v908_v14 = vld [vmem:[%s1189_s11 + $0x8] sm:$0xff]   ;;  %v909_v17 = vld [vmem:[%s1189_s11 + $0x10] sm:$0xff]   ;;  %p756_p7 = scmp.ne.s32.totalorder %s1013_s23, 1 }
  0x47   : > { %779 = vmatpush3.bf16.msra.mxu0 %v902_v9  ;;  %786 = vmatprep.mubr.msk.bf16.mxu0 %vm1033_vm1, %v1032_v10  ;;  %v905_v15 = vld [vmem:[%s309_s22 + $0x18] sm:$0xff]   ;;  %v906_v16 = vld [vmem:[%s1184_s9] sm:$0xff]   ;;  %v910_v18 = vld [vmem:[%s1189_s11 + $0x18] sm:$0xff]  }
  0x48   : > { %780 = vmatprep.subr.bf16.mxu0 %v1032_v10  ;;  %806 = vmatprep.mubr.msk.bf16.mxu1 %vm1033_vm1, %v1032_v10  ;;  %v911_v19 = vld [vmem:[%s1189_s11 + $0x20] sm:$0xff]   ;;  %v912_v20 = vld [vmem:[%s1189_s11 + $0x28] sm:$0xff]   ;;  %v913_v21 = vld [vmem:[%s1189_s11 + $0x30] sm:$0xff]  }
  0x49   : > { %791 = vmatpush3.bf16.msra.mxu1 %v907_v12  ;;  %v914_v22 = vld [vmem:[%s1189_s11 + $0x38] sm:$0xff]   ;;  %v741_v23 = vld [vmem:[%s355_s1] ss:$0 sm:$0xff]  ;;  %v473_v43 = vld [vmem:[#allocation2 + $0x8] sm:$0xff] }
  0x4a   : > { %792 = vmatprep.subr.bf16.mxu1 %v1032_v10  ;;  %v472_v41 = vld [vmem:[#allocation2] sm:$0xff] }
  0x4b   : > { %781 = vmatpush3.bf16.msra.mxu0 %v903_v11  ;;  %v757_v50 = vld [vmem:[%s1292_s4] ss:$0 sm:$0xff] (!%p756_p7) }
  0x4c   : > { %782 = vmatprep.subr.bf16.mxu0 %v1032_v10 }
  0x4d   : > { %793 = vmatpush3.bf16.msra.mxu1 %v908_v14 }
  0x4e   : > { %794 = vmatprep.subr.bf16.mxu1 %v1032_v10 }
  0x4f   : > { %783 = vmatpush3.bf16.msra.mxu0 %v904_v13 }
  0x50   : > { %784 = vmatprep.subr.bf16.mxu0 %v1032_v10 }
  0x51   : > { %795 = vmatpush3.bf16.msra.mxu1 %v909_v17 }
  0x52   : > { %796 = vmatprep.subr.bf16.mxu1 %v1032_v10 }
  0x53   : > { %785 = vmatpush3.bf16.msra.mxu0 %v905_v15 }
  0x55   : > { %797 = vmatpush3.bf16.msra.mxu1 %v910_v18 }
  0x56   : > { %787 = vmatmul.mubr.msk.bf16.vlgmr.msra.gmra.mrb[0].mxu0 %vm417_vm2, %v906_v16  ;;  %798 = vmatprep.subr.bf16.mxu1 %v1032_v10 }
  0x59   : > { %799 = vmatpush3.bf16.msra.mxu1 %v911_v19 }
  0x5a   : > { %800 = vmatprep.subr.bf16.mxu1 %v1032_v10 }
  0x5d   : > { %801 = vmatpush3.bf16.msra.mxu1 %v912_v20 }
  0x5e   : > { %802 = vmatprep.subr.bf16.mxu1 %v1032_v10 }
  0x61   : > { %803 = vmatpush3.bf16.msra.mxu1 %v913_v21 }
  0x62   : > { %804 = vmatprep.subr.bf16.mxu1 %v1032_v10 }
  0x65   : > { %805 = vmatpush3.bf16.msra.mxu1 %v914_v22 }
 0x129   : > { %v455_v24 = vpop.f32.mrb[0].mxu0 }
 0x12a   : > { %v456_v25 = vadd.f32 %v741_v23, %v455_v24  ;;  %v788_v26 = vpop.f32.mrb[1].mxu0 }
 0x12b   : > { %v458_v27 = vpop.f32.mrb[2].mxu0 }
 0x12c   : > { %v464_v28 = vmul.f32 0.70710677, %v456_v25  ;;  %v459_v29 = vadd.f32 %v741_v23, %v458_v27  ;;  %v789_v30 = vpop.f32.mrb[3].mxu0  ;;  %v462_v35 = vmul.f32 0.5, %v456_v25 }
 0x12e   : > { %915 = verf.f32 %v464_v28  ;;  %v465_v31 = vmul.f32 0.70710677, %v459_v29  ;;  %v463_v36 = vmul.f32 0.5, %v459_v29 }
 0x130   : > { %917 = verf.f32 %v465_v31 }
 0x138   : > { %v916_v32 = vpop.eup %915 }
 0x139   : > { %v468_v33 = vadd.f32 1.0, %v916_v32 }
 0x13a   : > { %v918_v34 = vpop.eup %917 }
 0x13b   : > { %v469_v37 = vadd.f32 1.0, %v918_v34  ;;  %v470_v38 = vmul.f32 %v468_v33, %v462_v35 }
 0x13d   : > { %v471_v39 = vmul.f32 %v469_v37, %v463_v36 }
 0x13f   : > { %v474_v40 = vpack.c.bf16 %v471_v39, %v470_v38 }
 0x141   : > { %807 = vmatmul.mubr.bf16.vlgmr.msra.gmra.mrb[0].mxu1 %v474_v40 }
 0x213   : > { %587 = sbr.rel (%p756_p7) target bundleno = 548 (0x224), region = 89 }
 0x214   : > { %v573_v42 = vpop.f32.mrb[0].mxu1 }
 0x215   : > { %v580_v44 = vadd.f32 %v573_v42, %v472_v41  ;;  %v808_v45 = vpop.f32.mrb[1].mxu1 }
 0x216   : > { %v576_v46 = vpop.f32.mrb[2].mxu1 }
 0x217   : > { %582 = vst.msk [vmem:[#allocation2] sm:$0xff] %vm417_vm2, %v580_v44  ;;  %v581_v47 = vadd.f32 %v576_v46, %v473_v43  ;;  %v809_v48 = vpop.f32.mrb[3].mxu1 }
 0x219   : > { %583 = vst.msk [vmem:[#allocation2 + $0x8] sm:$0xff] %vm417_vm2, %v581_v47 }
 0x21e   : > { %v588_v49 = vld [vmem:[#allocation2] sm:$0xff] }
 0x21f   : > { %v597_v52 = vadd.f32 %v757_v50, %v588_v49 }
 0x220   : > { %v589_v51 = vld [vmem:[#allocation2 + $0x8] sm:$0xff] }
 0x221   : > { %v598_v53 = vadd.f32 %v757_v50, %v589_v51  ;;  %599 = vst.msk [vmem:[%s1191_s14] sm:$0xff] %vm417_vm2, %v597_v52 }
 0x223   : > { %600 = vst.msk [vmem:[%s1191_s14 + $0x8] sm:$0xff] %vm417_vm2, %v598_v53 }
 0x224 PF: > { %s763_s23 = sshll.u32 %s1017_s24, 8  ;;  %s615_s12 = sshll.u32 %s1191_s14, 4  ;;  %s1226_s12 = int_to_ptr.vmem [resolvable:$true] %s615_s12 }
 0x225   : > { %s1223_s11 = scalar_lea.hbm %s1293_s5, %s763_s23  ;;  %s1312_s16 = sand.u32 1, %s997_s19  }
 0x226   : > { %s1230_s17 = scalar_lea.sflag [#allocation5], %s1312_s16  ;;  %s919_s28 = scalar_lea.vmem %s1226_s12, 256 }
 0x227   : > { %p920_p8 = scmp.ne.s32.totalorder %s1226_s12, %s919_s28  ;;  %s1034_s24 = smov [#allocation4]  }
 0x228   : > { %s923_s7 = sshll.u32 %s1034_s24, 4  ;;  %s924_s7 = int_to_ptr.vmem [resolvable:$false] %s923_s7 }
 0x229   : > { %p921_p9 = pnand %p920_p8, %p1146_p10  ;;  %s925_s8 = scalar_lea.vmem %s924_s7, 512 }
 0x22a   : > { %p926_p13 = scmp.lt.s32.totalorder %s1226_s12, %s924_s7  ;;  %p927_p0 = scmp.lt.s32.totalorder %s925_s8, %s919_s28 }
 0x22b   : > { %p922_p11 = pneg %p921_p9 }
 0x22c   : > { %p928_p1 = por %p927_p0, %p926_p13 }
 0x22e   : > { %p929_p2 = pnand %p928_p1, %p922_p11 }
 0x230   : > { %932 = shalt.err (!%p929_p2)
}
 0x231   : > { %s933_s14 = scalar_lea.hbm %s1223_s11, 256  ;;  %s937_s21 = scalar_lea.hbm %s1293_s5, 512 }
 0x232   : > { %p934_p3 = scmp.ne.s32.totalorder %s1223_s11, %s933_s14  ;;  %p938_p6 = scmp.lt.u32.totalorder %s1223_s11, %s1293_s5 }
 0x233   : > { %p939_p7 = scmp.lt.u32.totalorder %s937_s21, %s933_s14  ;;  %p941_p9 = scmp.lt.u32.totalorder %s933_s14, %s1223_s11 }
 0x234   : > { %p935_p4 = pnand %p934_p3, %p1146_p10 }
 0x235   : > { %p940_p8 = por %p939_p7, %p938_p6 }
 0x236   : > { %p936_p5 = pneg %p935_p4 }
 0x237   : > { %p942_p11 = por %p941_p9, %p940_p8 }
 0x239   : > { %p943_p13 = pnand %p942_p11, %p936_p5 }
 0x23b   : > { %946 = shalt.err (!%p943_p13)
}
 0x23c   : > { %s1035_s25 = smov 128   ;;  %s1036_s1 = smov 8  }
 0x23d   : > { %810 = dma.vmem_to_hbm [thread:$0]  (%p1146_p10), %s1226_s12, 256, %s1223_s11, %s1230_s17, %s1035_s25, %s1035_s25, %s1036_s1  }
 0x23e PF: > { %p816_p0 = scmp.ge.s32.totalorder %s1029_s27, 2  ;;  %s630_s26 = sand.u32 1, %s993_s18  }
 0x23f   : > { %s631_s23 = scalar_lea.sflag [#allocation5], %s630_s26 }
 0x240   : > { %p813_p1 = pnand %p816_p0, %p1153_p12 }
 0x242   : > { %988 = dma.done.wait (!%p813_p1), %s631_s23, 256  }
 0x243   : > { %990 = vsyncadd (!%p813_p1), %s631_s23, 4294967040  ;;  %s18_s27 = sadd.s32 1, %s1029_s27   ;;  %s1313_s30 = sld [smem:[#allocation13_spill]] }
 0x244   : > { %p15_p2 = scmp.ge.s32.totalorder %s18_s27, 6   ;;  %s1314_s21 = sld [smem:[#allocation7_spill]] }
 0x245   : > { %s1315_s22 = sld [smem:[#allocation12_spill]]  ;;  %s1316_s23 = sld [smem:[#allocation8_spill]] }
 0x246   : > { %s1317_s24 = sld [smem:[#allocation9_spill]]  ;;  %s1318_s25 = sld [smem:[#allocation10_spill]] }
 0x247   : > { %s1319_s26 = sld [smem:[#allocation11_spill]]  ;;  %s1320_s18 = smov %s997_s19 }
 0x248   : > { %s1321_s19 = smov %s1001_s20  ;;  %17 = sbr.rel (!%p15_p2) target bundleno = 8 (0x8), region = 138 }
 0x249   : > { %s1322_s20 = smov %s1313_s30 }
 0x24f   :  { %636 = vsyncpa [#allocation5], 1 }
 0x250   :  { %638 = vsyncpa [#allocation5 + $0x1], 1 }

</bundles_post_ra>
